<compile_context>
chip_gen: v5e
topology: v5e:2x2
jax: 0.10.0
libtpu: 0.0.40
codegen_flags: <defaults>
</compile_context>

<pallas_src>
import jax
import jax.numpy as jnp
import numpy as np
from jax import lax
from jax.experimental import pallas as pl
from jax.experimental.pallas import tpu as pltpu

SMOOTH_EPS = 0.001
N_ACTIONS = 4
LAYER_DIMS = [(2, 8), (8, 32), (32, 32), (32, 4)]   # (in, out) of each nn.Linear

# Packed-parameter slab layout (built once in pack_params):
#   rows [off : off+n_out], cols [0 : n_in]  -> W.T of that layer  (out, in)
#   rows [off : off+n_out], col  _BIAS_COL   -> bias of that layer (out,)
_BIAS_COL = max(n_in for n_in, _ in LAYER_DIMS)                 # 32
_LAYER_OFFS = []
_r = 0
for _n_in, _n_out in LAYER_DIMS:
    _LAYER_OFFS.append((_r, _n_in, _n_out))
    _r += _n_out
_SLAB_ROWS = ((_r + 7) // 8) * 8                                # 76 -> 80
_SLAB_COLS = 128                                                # one lane tile


# ---------------------------------------------------------------------------
# Single fused kernel: MLP + softmax + smoothing, batch on lanes.
#   x_ref : (2, tn)        p_ref : (80, 128)      o_ref : (4, tn)
# ---------------------------------------------------------------------------
def _feature_policy_kernel(x_ref, p_ref, o_ref):
    x = x_ref[...]                                              # (2, tn) f32

    # ---- layer 1 (2 -> 8): VPU broadcast-FMA, skip the MXU round-trip ----
    r0, n_in0, n_out0 = _LAYER_OFFS[0]
    w1 = p_ref[r0:r0 + n_out0, 0:n_in0]                         # (8, 2)
    b1 = p_ref[r0:r0 + n_out0, _BIAS_COL:_BIAS_COL + 1]         # (8, 1)
    h = w1[:, 0:1] * x[0:1, :] + w1[:, 1:2] * x[1:2, :] + b1    # (8, tn)
    h = jnp.maximum(h, 0.0)

    # ---- layers 2..4: MXU dots with f32 accumulation ----
    for li in range(1, len(LAYER_DIMS)):
        r, n_in, n_out = _LAYER_OFFS[li]
        w = p_ref[r:r + n_out, 0:n_in]                          # (out, in)
        b = p_ref[r:r + n_out, _BIAS_COL:_BIAS_COL + 1]         # (out, 1)
        h = jnp.dot(w, h, preferred_element_type=jnp.float32) + b
        if li < len(LAYER_DIMS) - 1:
            h = jnp.maximum(h, 0.0)                             # (out, tn)

    # ---- softmax over actions (axis 0 here == PyTorch dim=1) + smoothing ----
    m = jnp.max(h, axis=0, keepdims=True)                       # (1, tn)
    e = jnp.exp(h - m)                                          # (4, tn)
    s = jnp.sum(e, axis=0, keepdims=True)                       # (1, tn)
    inv = pl.reciprocal(s, approx=True)                         # EUP, ~free
    c = 1.0 / (1.0 + SMOOTH_EPS * N_ACTIONS)                    # fold smoothing
    o_ref[...] = (e * (inv * c) + SMOOTH_EPS * c).astype(o_ref.dtype)


# ---------------------------------------------------------------------------
# Wrapper: transpose batch onto lanes, pick the grid, slice back.
# ---------------------------------------------------------------------------
def feature_policy_forward(x, slab, *, max_tile=1024):
    """x: (B, 2) f32, slab: packed params (80, 128) f32 -> (B, 4) f32."""
    B, f_in = x.shape
    assert f_in == LAYER_DIMS[0][0]

    # Lane dim must be a multiple of 128; single grid step for small batches,
    # 1024-wide "parallel" steps otherwise (v7x megacore shards them).
    Bp = ((B + 127) // 128) * 128
    if Bp <= max_tile:
        tn = Bp
    else:
        tn = max_tile
        Bp = ((Bp + tn - 1) // tn) * tn

    xt = x.T                                                    # (2, B)
    if Bp != B:
        xt = jnp.pad(xt, ((0, 0), (0, Bp - B)))                 # pad lanes

    flops = 2 * Bp * sum(i * o for i, o in LAYER_DIMS)
    bytes_accessed = 4 * (Bp * f_in + Bp * N_ACTIONS + slab.size)

    out = pl.pallas_call(
        _feature_policy_kernel,
        out_shape=jax.ShapeDtypeStruct((N_ACTIONS, Bp), jnp.float32),
        grid=(Bp // tn,),
        in_specs=[
            pl.BlockSpec((f_in, tn), lambda i: (0, i)),         # batch tile (lanes)
            pl.BlockSpec((_SLAB_ROWS, _SLAB_COLS), lambda i: (0, 0)),  # resident params
        ],
        out_specs=pl.BlockSpec((N_ACTIONS, tn), lambda i: (0, i)),
        compiler_params=pltpu.CompilerParams(
            dimension_semantics=("parallel",)),
        cost_estimate=pl.CostEstimate(flops=flops,
                                      transcendentals=Bp * (N_ACTIONS + 1),
                                      bytes_accessed=bytes_accessed),
    )(xt, slab)
    return out[:, :B].T                                         # (B, 4)


# ---------------------------------------------------------------------------
# Parameter init (mirrors nn.Linear default U(-1/sqrt(fan_in), ..)) + packing.
# ---------------------------------------------------------------------------
def init_params(key):
    params = []
    for (n_in, n_out) in LAYER_DIMS:
        key, kw, kb = jax.random.split(key, 3)
        bound = 1.0 / float(np.sqrt(n_in))
        w = jax.random.uniform(kw, (n_in, n_out), jnp.float32, -bound, bound)
        b = jax.random.uniform(kb, (n_out,), jnp.float32, -bound, bound)
        params.append((w, b))
    return params


def pack_params(params):
    """Pack all layers into one (80, 128) f32 slab: wT in cols 0:in, bias in col 32."""
    slab = np.zeros((_SLAB_ROWS, _SLAB_COLS), np.float32)
    for (off, n_in, n_out), (w, b) in zip(_LAYER_OFFS, params):
        slab[off:off + n_out, 0:n_in] = np.asarray(w).T
        slab[off:off + n_out, _BIAS_COL] = np.asarray(b)
    return jnp.asarray(slab)


# ---------------------------------------------------------------------------
# Plain-JAX reference of the same forward pass
# ---------------------------------------------------------------------------
def feature_policy_reference(x, params):
    h = x
    for li, (w, b) in enumerate(params):
        h = jnp.dot(h, w, precision=lax.Precision.HIGHEST) + b
        if li < len(params) - 1:
            h = jnp.maximum(h, 0.0)
    p = jax.nn.softmax(h, axis=1)
    return (p + SMOOTH_EPS) / (1.0 + SMOOTH_EPS * N_ACTIONS)


if __name__ == "__main__":
    key = jax.random.PRNGKey(0)
    key, kx = jax.random.split(key)
    params = init_params(key)
    slab = pack_params(params)

    # 256 states x 2 features -> (256, 4) smoothed action distribution
    x = jax.random.normal(kx, (256, 2), jnp.float32)

    out = jax.block_until_ready(feature_policy_forward(x, slab))
    ref = jax.block_until_ready(feature_policy_reference(x, params))

    assert out.shape == (256, N_ACTIONS), out.shape
    out_np = np.asarray(out)
    # Each row is a smoothed probability simplex: sums to ~1 (approx-recip slack).
    np.testing.assert_allclose(out_np.sum(axis=1), np.ones(256), rtol=2e-3, atol=2e-3)
    np.testing.assert_allclose(out_np, np.asarray(ref), rtol=2e-3, atol=2e-3)
    print("KERNEL_OK")
</pallas_src>

<mosaic_0001>
module attributes {stable_mosaic.version = 11 : i64} {
  func.func @_feature_policy_kernel(%arg0: i32, %arg1: memref<2x256xf32, #tpu.memory_space<vmem>>, %arg2: memref<80x128xf32, #tpu.memory_space<vmem>>, %arg3: memref<4x256xf32, #tpu.memory_space<vmem>>) attributes {dimension_semantics = [#tpu.dimension_semantics<parallel>], iteration_bounds = array<i64: 1>, scalar_prefetch = 0 : i64, scratch_operands = 0 : i64, tpu.core_type = #tpu.core_type<tc>, window_params = [{transform_indices = @transform_0, window_bounds = array<i64: 2, 256>}, {pipeline_mode = #tpu.pipeline_mode<synchronous>, transform_indices = @transform_1, window_bounds = array<i64: 80, 128>}, {transform_indices = @transform_2, window_bounds = array<i64: 4, 256>}]} {
    %c0 = arith.constant 0 : index
    %c0_0 = arith.constant 0 : index
    %0 = vector.load %arg1[%c0, %c0_0] : memref<2x256xf32, #tpu.memory_space<vmem>>, vector<2x256xf32>
    %c0_1 = arith.constant 0 : index
    %c0_2 = arith.constant 0 : index
    %1 = vector.load %arg2[%c0_1, %c0_2] : memref<80x128xf32, #tpu.memory_space<vmem>>, vector<8x2xf32>
    %c0_3 = arith.constant 0 : index
    %c32 = arith.constant 32 : index
    %2 = vector.load %arg2[%c0_3, %c32] : memref<80x128xf32, #tpu.memory_space<vmem>>, vector<8x1xf32>
    %3 = vector.extract_strided_slice %1 {offsets = [0, 0], sizes = [8, 1], strides = [1, 1]} : vector<8x2xf32> to vector<8x1xf32>
    %4 = vector.extract_strided_slice %0 {offsets = [0, 0], sizes = [1, 256], strides = [1, 1]} : vector<2x256xf32> to vector<1x256xf32>
    %5 = vector.broadcast %3 : vector<8x1xf32> to vector<8x256xf32>
    %6 = vector.broadcast %4 : vector<1x256xf32> to vector<8x256xf32>
    %7 = arith.mulf %5, %6 : vector<8x256xf32>
    %8 = vector.extract_strided_slice %1 {offsets = [0, 1], sizes = [8, 1], strides = [1, 1]} : vector<8x2xf32> to vector<8x1xf32>
    %9 = vector.extract_strided_slice %0 {offsets = [1, 0], sizes = [1, 256], strides = [1, 1]} : vector<2x256xf32> to vector<1x256xf32>
    %10 = vector.broadcast %8 : vector<8x1xf32> to vector<8x256xf32>
    %11 = vector.broadcast %9 : vector<1x256xf32> to vector<8x256xf32>
    %12 = arith.mulf %10, %11 : vector<8x256xf32>
    %13 = arith.addf %7, %12 : vector<8x256xf32>
    %14 = vector.broadcast %2 : vector<8x1xf32> to vector<8x256xf32>
    %15 = arith.addf %13, %14 : vector<8x256xf32>
    %cst = arith.constant 0.000000e+00 : f32
    %16 = vector.broadcast %cst : f32 to vector<8x256xf32>
    %17 = arith.maximumf %15, %16 : vector<8x256xf32>
    %c8 = arith.constant 8 : index
    %c0_4 = arith.constant 0 : index
    %18 = vector.load %arg2[%c8, %c0_4] : memref<80x128xf32, #tpu.memory_space<vmem>>, vector<32x8xf32>
    %c8_5 = arith.constant 8 : index
    %c32_6 = arith.constant 32 : index
    %19 = vector.load %arg2[%c8_5, %c32_6] : memref<80x128xf32, #tpu.memory_space<vmem>>, vector<32x1xf32>
    %cst_7 = arith.constant dense<0.000000e+00> : vector<32x256xf32>
    %20 = tpu.matmul %18, %17, %cst_7 {dimension_numbers = #tpu.dot_dimension_numbers<[1], [0], [0], [1], [0, 0, 1, 1], [], []>} : vector<32x8xf32>, vector<8x256xf32>, vector<32x256xf32> -> vector<32x256xf32>
    %21 = vector.broadcast %19 : vector<32x1xf32> to vector<32x256xf32>
    %22 = arith.addf %20, %21 : vector<32x256xf32>
    %cst_8 = arith.constant 0.000000e+00 : f32
    %23 = vector.broadcast %cst_8 : f32 to vector<32x256xf32>
    %24 = arith.maximumf %22, %23 : vector<32x256xf32>
    %c40 = arith.constant 40 : index
    %c0_9 = arith.constant 0 : index
    %25 = vector.load %arg2[%c40, %c0_9] : memref<80x128xf32, #tpu.memory_space<vmem>>, vector<32x32xf32>
    %c40_10 = arith.constant 40 : index
    %c32_11 = arith.constant 32 : index
    %26 = vector.load %arg2[%c40_10, %c32_11] : memref<80x128xf32, #tpu.memory_space<vmem>>, vector<32x1xf32>
    %cst_12 = arith.constant dense<0.000000e+00> : vector<32x256xf32>
    %27 = tpu.matmul %25, %24, %cst_12 {dimension_numbers = #tpu.dot_dimension_numbers<[1], [0], [0], [1], [0, 0, 1, 1], [], []>} : vector<32x32xf32>, vector<32x256xf32>, vector<32x256xf32> -> vector<32x256xf32>
    %28 = vector.broadcast %26 : vector<32x1xf32> to vector<32x256xf32>
    %29 = arith.addf %27, %28 : vector<32x256xf32>
    %cst_13 = arith.constant 0.000000e+00 : f32
    %30 = vector.broadcast %cst_13 : f32 to vector<32x256xf32>
    %31 = arith.maximumf %29, %30 : vector<32x256xf32>
    %c72 = arith.constant 72 : index
    %c0_14 = arith.constant 0 : index
    %32 = vector.load %arg2[%c72, %c0_14] : memref<80x128xf32, #tpu.memory_space<vmem>>, vector<4x32xf32>
    %c72_15 = arith.constant 72 : index
    %c32_16 = arith.constant 32 : index
    %33 = vector.load %arg2[%c72_15, %c32_16] : memref<80x128xf32, #tpu.memory_space<vmem>>, vector<4x1xf32>
    %cst_17 = arith.constant dense<0.000000e+00> : vector<4x256xf32>
    %34 = tpu.matmul %32, %31, %cst_17 {dimension_numbers = #tpu.dot_dimension_numbers<[1], [0], [0], [1], [0, 0, 1, 1], [], []>} : vector<4x32xf32>, vector<32x256xf32>, vector<4x256xf32> -> vector<4x256xf32>
    %35 = vector.broadcast %33 : vector<4x1xf32> to vector<4x256xf32>
    %36 = arith.addf %34, %35 : vector<4x256xf32>
    %cst_18 = arith.constant dense<0xFF800000> : vector<256xf32>
    %37 = vector.multi_reduction <maximumf>, %36, %cst_18 [0] : vector<4x256xf32> to vector<256xf32>
    %38 = vector.shape_cast %37 : vector<256xf32> to vector<1x256xf32>
    %39 = vector.broadcast %38 : vector<1x256xf32> to vector<4x256xf32>
    %40 = arith.subf %36, %39 : vector<4x256xf32>
    %41 = math.exp %40 : vector<4x256xf32>
    %cst_19 = arith.constant dense<0.000000e+00> : vector<256xf32>
    %42 = vector.multi_reduction <add>, %41, %cst_19 [0] : vector<4x256xf32> to vector<256xf32>
    %43 = vector.shape_cast %42 : vector<256xf32> to vector<1x256xf32>
    %44 = tpu.reciprocal %43 {approx = true} : vector<1x256xf32> -> vector<1x256xf32>
    %cst_20 = arith.constant 0.996015965 : f32
    %45 = vector.broadcast %cst_20 : f32 to vector<1x256xf32>
    %46 = arith.mulf %44, %45 : vector<1x256xf32>
    %47 = vector.broadcast %46 : vector<1x256xf32> to vector<4x256xf32>
    %48 = arith.mulf %41, %47 : vector<4x256xf32>
    %cst_21 = arith.constant 9.96015965E-4 : f32
    %49 = vector.broadcast %cst_21 : f32 to vector<4x256xf32>
    %50 = arith.addf %48, %49 : vector<4x256xf32>
    %c0_22 = arith.constant 0 : index
    %c0_23 = arith.constant 0 : index
    %51 = vector.load %arg3[%c0_22, %c0_23] : memref<4x256xf32, #tpu.memory_space<vmem>>, vector<4x256xf32>
    tpu.vector_store %arg3[%c0_22, %c0_23], %50 {strides = array<i32>} : memref<4x256xf32, #tpu.memory_space<vmem>>, vector<4x256xf32>,
    return
  }
  func.func @transform_0(%arg0: i32) -> (i32, i32) {
    %c0_i32 = arith.constant 0 : i32
    %c0_i32_0 = arith.constant 0 : i32
    return %c0_i32, %arg0 : i32, i32
  }
  func.func @transform_1(%arg0: i32) -> (i32, i32) {
    %c0_i32 = arith.constant 0 : i32
    %c0_i32_0 = arith.constant 0 : i32
    %c0_i32_1 = arith.constant 0 : i32
    return %c0_i32, %c0_i32_0 : i32, i32
  }
  func.func @transform_2(%arg0: i32) -> (i32, i32) {
    %c0_i32 = arith.constant 0 : i32
    %c0_i32_0 = arith.constant 0 : i32
    return %c0_i32, %arg0 : i32, i32
  }
}

</mosaic_0001>

<bundles_post_ra>
// kernel: tpu_custom_call.1
= control target key start
LH: loop header
LB: loop body
LE: loop exit
PB: predicated region body
PF: predicated region fallthrough
CT: control target
= control target key end

     0   :  { %7 = vsyncpa [#allocation3], 0  ;;  %s572_s0 = inlined_call_operand.hbm [shape: f32[2,256], index: 0, kind: input, shape index: {}]   ;;  %s573_s1 = inlined_call_operand.hbm [shape: f32[80,128], index: 1, kind: input, shape index: {}]   ;;  %s574_s2 = inlined_call_operand.hbm [shape: f32[4,256], index: 2, kind: output, shape index: {}]  }
   0x1   :  { %8 = vsyncpa [#allocation6], 0 }
   0x2   :  { %9 = vsyncpa [#allocation4], 0  ;;  %s15_s11 = sshll.u32 %s572_s0, 4  ;;  %s510_s12 = smov [#allocation2]   ;;  %s16_s11 = int_to_ptr.hbm [resolvable:$true] %s15_s11 }
   0x3   :  { %s17_s13 = sshll.u32 %s510_s12, 4  ;;  %s25_s16 = sshll.u32 %s573_s1, 4  ;;  %s18_s13 = int_to_ptr.vmem [resolvable:$true] %s17_s13  ;;  %s26_s16 = int_to_ptr.hbm [resolvable:$true] %s25_s16 }
   0x4   :  { %20 = dma.hbm_to_vmem [thread:$0]  %s16_s11, 64, %s18_s13, [#allocation3]  }
   0x5   :  { %s511_s17 = smov [#allocation5]   ;;  %s512_s19 = smov 128  }
   0x6   :  { %s27_s18 = sshll.u32 %s511_s17, 4  ;;  %s513_s20 = smov 8   ;;  %s28_s18 = int_to_ptr.vmem [resolvable:$true] %s27_s18 }
   0x7   :  { %33 = dma.hbm_to_vmem [thread:$0]  %s26_s16, 1280, %s28_s18, [#allocation6], %s512_s19, %s512_s19, %s513_s20  }
   0x8   :  { %504 = dma.done.wait [#allocation3], 64  }
   0x9   :  { %505 = vsyncadd [#allocation3], 4294967232 }
   0xa   :  { %506 = dma.done.wait [#allocation6], 1280  }
   0xb   :  { %507 = vsyncadd [#allocation6], 4294966016  ;;  %v514_v0 = vmov 32   ;;  %v515_v1 = vmov 0   ;;  %v43_v2 = vld [vmem:[#allocation5] sm:$0xff]  ;;  %v516_v4 = vmov 1  }
   0xc   :  { %421 = vset.pattern.permute.xlu1 %v514_v0  ;;  %419 = vset.pattern.permute.xlu0 %v515_v1  ;;  %v83_v3 = vld [vmem:[#allocation5 + $0x20] sm:$0xff]  ;;  %v80_v5 = vld [vmem:[#allocation5 + $0x8] sm:$0xff]  ;;  %v539_v6 = vld [vmem:[#allocation5 + $0x30] sm:$0xff]  ;;  %vm104_vm0 = vcmask 64512   ;;  %vm203_vm1 = vcmask 261120   ;;  %vm326_vm2 = vcmask 1043456  }
   0xd   :  { %422 = vset.pattern.permute.xlu2 %v514_v0  ;;  %73 = vperm.xlu1 %421, %v43_v2   ;;  %v542_v7 = vld [vmem:[#allocation5 + $0x48] sm:$0xf]  ;;  %v42_v8 = vld [vmem:[#allocation2] sm:$0xf]  ;;  %v81_v19 = vld [vmem:[#allocation5 + $0x10] sm:$0xff]  ;;  %s517_s0 = smov [#allocation7]  }
   0xe   :  { %46 = vperm.xlu0 %419, %v43_v2   ;;  %v82_v10 = vld [vmem:[#allocation5 + $0x18] sm:$0xff]  ;;  %v50_v11 = vperm.slane %v42_v8, 0  ;;  %v51_v12 = vperm.slane %v42_v8, 2  ;;  %v62_v13 = vperm.slane %v42_v8, 1  ;;  %v63_v14 = vperm.slane %v42_v8, 3  ;;  %v545_v30 = vld [vmem:[#allocation5 + $0x40] sm:$0xff] }
   0xf   :  { %96 = vperm.xlu2 %422, %v82_v10   ;;  %v179_v33 = vld [vmem:[#allocation5 + $0x28] sm:$0xff]  ;;  %v181_v38 = vld [vmem:[#allocation5 + $0x38] sm:$0xff]  ;;  %s380_s1 = sshll.u32 %s517_s0, 4  ;;  %s382_s23 = sshll.u32 %s574_s2, 4  ;;  %s381_s1 = int_to_ptr.vmem [resolvable:$true] %s380_s1  ;;  %s383_s23 = int_to_ptr.hbm [resolvable:$true] %s382_s23 }
  0x10   :  { %v54_v15 = vperm.slane %v50_v11, 0  ;;  %v55_v16 = vperm.slane %v51_v12, 0  ;;  %v66_v17 = vperm.slane %v62_v13, 1  ;;  %v67_v18 = vperm.slane %v63_v14, 1 }
  0x15   :  { %101 = vperm.xlu1 %421, %v83_v3  }
  0x16   :  { %420 = vset.pattern.permute.xlu0 %v516_v4 }
  0x17   :  { %59 = vperm.xlu0 %420, %v43_v2   ;;  %91 = vperm.xlu2 %422, %v81_v19  }
  0x1d   :  { %86 = vperm.xlu1 %421, %v80_v5  }
  0x1f   :  { %423 = vset.pattern.permute.xlu0 %v514_v0  ;;  %200 = vperm.xlu2 %422, %v545_v30  }
  0x20   :  { %195 = vperm.xlu0 %423, %v181_v38  }
  0x25   :  { %190 = vperm.xlu1 %421, %v539_v6  }
  0x27   :  { %185 = vperm.xlu2 %422, %v179_v33  }
  0x2d   :  { %281 = vperm.xlu1 %421, %v542_v7  }
  0x69   :  { %v97_v39 = vpop.permute.xlu2 %96 }
  0x71   :  { %v92_v49 = vpop.permute.xlu2 %91 }
  0x7f   :  { %v74_v27 = vpop.permute.xlu1 %73 }
  0x80   :  { %v47_v9 = vpop.permute.xlu0 %46 }
  0x81   :  { %v56_v21 = vmul.f32 %v54_v15, %v47_v9  ;;  %v57_v22 = vmul.f32 %v55_v16, %v47_v9 }
  0x87   :  { %v102_v42 = vpop.permute.xlu1 %101 }
  0x89   :  { %v60_v20 = vpop.permute.xlu0 %59 }
  0x8a   :  { %v68_v23 = vmul.f32 %v66_v17, %v60_v20  ;;  %v69_v24 = vmul.f32 %v67_v18, %v60_v20 }
  0x8c   :  { %v70_v25 = vadd.f32 %v68_v23, %v56_v21  ;;  %v71_v26 = vadd.f32 %v69_v24, %v57_v22 }
  0x8e   :  { %v76_v28 = vadd.f32 %v74_v27, %v70_v25  ;;  %v77_v29 = vadd.f32 %v74_v27, %v71_v26 }
  0x8f   :  { %v87_v54 = vpop.permute.xlu1 %86 }
  0x90   :  { %v78_v31 = vmax.f32 %v76_v28, 0.0  ;;  %v79_v32 = vmax.f32 %v77_v29, 0.0 }
  0x92   :  { %128 = vmatpush.msra.mxu0 %v78_v31  ;;  %157 = vmatpush.msra.mxu1 %v79_v32  ;;  %v196_v8 = vpop.permute.xlu0 %195 }
  0x93   :  { %393 = vmatmul.msk.f32.vlgmr.msra.gmra.mxu0 %vm104_vm0, %v80_v5  ;;  %397 = vmatmul.msk.f32.vlgmr.msra.gmra.mxu1 %vm104_vm0, %v80_v5  ;;  %v201_v5 = vpop.permute.xlu2 %200 }
  0x97   :  { %v191_v14 = vpop.permute.xlu1 %190 }
  0x9b   :  { %394 = vmatmul.msk.f32.gmra.mxu0 %vm104_vm0, %v81_v19  ;;  %398 = vmatmul.msk.f32.gmra.mxu1 %vm104_vm0, %v81_v19  ;;  %v186_v19 = vpop.permute.xlu2 %185 }
  0x9f   :  { %v282_v28 = vpop.permute.xlu1 %281 }
  0xa3   :  { %395 = vmatmul.msk.f32.gmra.mxu0 %vm104_vm0, %v82_v10  ;;  %399 = vmatmul.msk.f32.gmra.mxu1 %vm104_vm0, %v82_v10 }
  0xab   :  { %396 = vmatmul.msk.f32.gmra.mxu0 %vm104_vm0, %v83_v3  ;;  %400 = vmatmul.msk.f32.gmra.mxu1 %vm104_vm0, %v83_v3 }
 0x110   :  { %v130_v34 = vpop.f32.mrf.mxu0  ;;  %v159_v35 = vpop.f32.mrf.mxu1 }
 0x111   :  { %v131_v55 = vadd.f32 %v130_v34, %v87_v54  ;;  %v160_v56 = vadd.f32 %v159_v35, %v87_v54 }
 0x113   :  { %v171_v61 = vmax.f32 %v131_v55, 0.0  ;;  %v172_v62 = vmax.f32 %v160_v56, 0.0 }
 0x118   :  { %v133_v36 = vpop.f32.mrf.mxu0  ;;  %v162_v37 = vpop.f32.mrf.mxu1 }
 0x119   :  { %v134_v50 = vadd.f32 %v133_v36, %v92_v49  ;;  %v163_v51 = vadd.f32 %v162_v37, %v92_v49 }
 0x11b   :  { %v173_v59 = vmax.f32 %v134_v50, 0.0  ;;  %v174_v60 = vmax.f32 %v163_v51, 0.0 }
 0x120   :  { %v136_v40 = vpop.f32.mrf.mxu0  ;;  %v165_v41 = vpop.f32.mrf.mxu1 }
 0x121   :  { %v137_v45 = vadd.f32 %v136_v40, %v97_v39  ;;  %v166_v46 = vadd.f32 %v165_v41, %v97_v39 }
 0x123   :  { %v175_v57 = vmax.f32 %v137_v45, 0.0  ;;  %v176_v58 = vmax.f32 %v166_v46, 0.0 }
 0x128   :  { %v139_v43 = vpop.f32.mrf.mxu0  ;;  %v168_v44 = vpop.f32.mrf.mxu1 }
 0x129   :  { %v140_v47 = vadd.f32 %v139_v43, %v102_v42  ;;  %v169_v48 = vadd.f32 %v168_v44, %v102_v42 }
 0x12b   :  { %v177_v52 = vmax.f32 %v140_v47, 0.0  ;;  %v178_v53 = vmax.f32 %v169_v48, 0.0 }
 0x12d   :  { %224 = vmatpush.msra.mxu2 %v177_v52  ;;  %253 = vmatpush.msra.mxu3 %v178_v53 }
 0x12f   :  { %225 = vmatpush.msra.mxu2 %v175_v57  ;;  %254 = vmatpush.msra.mxu3 %v176_v58 }
 0x131   :  { %226 = vmatpush.msra.mxu2 %v173_v59  ;;  %255 = vmatpush.msra.mxu3 %v174_v60 }
 0x133   :  { %227 = vmatpush.msra.mxu2 %v171_v61  ;;  %256 = vmatpush.msra.mxu3 %v172_v62 }
 0x134   :  { %401 = vmatmul.msk.f32.vlgmr.msra.gmra.mxu2 %vm203_vm1, %v179_v33  ;;  %405 = vmatmul.msk.f32.vlgmr.msra.gmra.mxu3 %vm203_vm1, %v179_v33 }
 0x13c   :  { %402 = vmatmul.msk.f32.gmra.mxu2 %vm203_vm1, %v539_v6  ;;  %406 = vmatmul.msk.f32.gmra.mxu3 %vm203_vm1, %v539_v6 }
 0x144   :  { %403 = vmatmul.msk.f32.gmra.mxu2 %vm203_vm1, %v181_v38  ;;  %407 = vmatmul.msk.f32.gmra.mxu3 %vm203_vm1, %v181_v38 }
 0x14c   :  { %404 = vmatmul.msk.f32.gmra.mxu2 %vm203_vm1, %v545_v30  ;;  %408 = vmatmul.msk.f32.gmra.mxu3 %vm203_vm1, %v545_v30 }
 0x1b7   :  { %v229_v63 = vpop.f32.mrf.mxu2  ;;  %v258_v0 = vpop.f32.mrf.mxu3 }
 0x1b8   :  { %v230_v20 = vadd.f32 %v229_v63, %v186_v19  ;;  %v259_v21 = vadd.f32 %v258_v0, %v186_v19 }
 0x1ba   :  { %v270_v26 = vmax.f32 %v230_v20, 0.0  ;;  %v271_v27 = vmax.f32 %v259_v21, 0.0 }
 0x1bf   :  { %v232_v1 = vpop.f32.mrf.mxu2  ;;  %v261_v2 = vpop.f32.mrf.mxu3 }
 0x1c0   :  { %v233_v15 = vadd.f32 %v232_v1, %v191_v14  ;;  %v262_v16 = vadd.f32 %v261_v2, %v191_v14 }
 0x1c2   :  { %v272_v24 = vmax.f32 %v233_v15, 0.0  ;;  %v273_v25 = vmax.f32 %v262_v16, 0.0 }
 0x1c7   :  { %v235_v3 = vpop.f32.mrf.mxu2  ;;  %v264_v4 = vpop.f32.mrf.mxu3 }
 0x1c8   :  { %v236_v10 = vadd.f32 %v235_v3, %v196_v8  ;;  %v265_v11 = vadd.f32 %v264_v4, %v196_v8 }
 0x1ca   :  { %v274_v22 = vmax.f32 %v236_v10, 0.0  ;;  %v275_v23 = vmax.f32 %v265_v11, 0.0 }
 0x1cf   :  { %v238_v9 = vpop.f32.mrf.mxu2  ;;  %v267_v6 = vpop.f32.mrf.mxu3 }
 0x1d0   :  { %v239_v12 = vadd.f32 %v238_v9, %v201_v5  ;;  %v268_v13 = vadd.f32 %v267_v6, %v201_v5 }
 0x1d2   :  { %v276_v17 = vmax.f32 %v239_v12, 0.0  ;;  %v277_v18 = vmax.f32 %v268_v13, 0.0 }
 0x1d4   :  { %298 = vmatpush.msrb.mxu0 %v276_v17  ;;  %318 = vmatpush.msrb.mxu1 %v277_v18 }
 0x1d6   :  { %299 = vmatpush.msrb.mxu0 %v274_v22  ;;  %319 = vmatpush.msrb.mxu1 %v275_v23 }
 0x1d8   :  { %300 = vmatpush.msrb.mxu0 %v272_v24  ;;  %320 = vmatpush.msrb.mxu1 %v273_v25 }
 0x1da   :  { %301 = vmatpush.msrb.mxu0 %v270_v26  ;;  %321 = vmatpush.msrb.mxu1 %v271_v27 }
 0x1db   :  { %409 = vmatmul.msk.f32.vlgmr.msrb.gmra.mxu0 %vm203_vm1, %v542_v7  ;;  %410 = vmatmul.msk.f32.vlgmr.msrb.gmra.mxu1 %vm203_vm1, %v542_v7 }
 0x258   :  { %v303_v29 = vpop.f32.mrf.mxu0  ;;  %v323_v30 = vpop.f32.mrf.mxu1 }
 0x259   :  { %v304_v31 = vadd.f32 %v303_v29, %v282_v28  ;;  %v324_v32 = vadd.f32 %v323_v30, %v282_v28 }
 0x25b   :  { %v327_v33 = vsel %vm326_vm2, %v304_v31, -inf  ;;  %v334_v34 = vsel %vm326_vm2, %v324_v32, -inf }
 0x25c   :  { %v328_v35 = vrot.slane %v327_v33, 4  ;;  %v335_v36 = vrot.slane %v334_v34, 4 }
 0x25e   :  { %v329_v37 = vmax.f32 %v327_v33, %v328_v35  ;;  %v336_v38 = vmax.f32 %v334_v34, %v335_v36 }
 0x260   :  { %v330_v39 = vrot.slane %v329_v37, 2  ;;  %v337_v40 = vrot.slane %v336_v38, 2 }
 0x262   :  { %v331_v41 = vmax.f32 %v329_v37, %v330_v39  ;;  %v338_v42 = vmax.f32 %v336_v38, %v337_v40 }
 0x264   :  { %v332_v43 = vrot.slane %v331_v41, 1  ;;  %v339_v7 = vrot.slane %v338_v42, 1 }
 0x266   :  { %v333_v44 = vmax.f32 %v331_v41, %v332_v43  ;;  %v340_v45 = vmax.f32 %v338_v42, %v339_v7 }
 0x268   :  { %v341_v46 = vsub.f32 %v304_v31, %v333_v44  ;;  %v342_v47 = vsub.f32 %v324_v32, %v340_v45 }
 0x26a   :  { %v343_v48 = vmul.f32 1.442695, %v341_v46  ;;  %v345_v49 = vmul.f32 1.442695, %v342_v47 }
 0x26c   :  { %424 = vpow2.f32 %v343_v48 }
 0x26d   :  { %426 = vpow2.f32 %v345_v49 }
 0x272   :  { %v425_v50 = vpop.eup %424 }
 0x273   :  { %v427_v51 = vpop.eup %426  ;;  %v347_v52 = vsel %vm326_vm2, %v425_v50, 0.0 }
 0x274   :  { %v348_v53 = vrot.slane %v347_v52, 4  ;;  %v354_v54 = vsel %vm326_vm2, %v427_v51, 0.0 }
 0x275   :  { %v355_v55 = vrot.slane %v354_v54, 4 }
 0x276   :  { %v349_v56 = vadd.f32 %v348_v53, %v347_v52 }
 0x277   :  { %v356_v57 = vadd.f32 %v355_v55, %v354_v54 }
 0x278   :  { %v350_v58 = vrot.slane %v349_v56, 2 }
 0x279   :  { %v357_v59 = vrot.slane %v356_v57, 2 }
 0x27a   :  { %v351_v60 = vadd.f32 %v350_v58, %v349_v56 }
 0x27b   :  { %v358_v61 = vadd.f32 %v357_v59, %v356_v57 }
 0x27c   :  { %v352_v62 = vrot.slane %v351_v60, 1 }
 0x27d   :  { %v359_v63 = vrot.slane %v358_v61, 1 }
 0x27e   :  { %v353_v0 = vadd.f32 %v352_v62, %v351_v60 }
 0x27f   :  { %v360_v1 = vadd.f32 %v359_v63, %v358_v61 }
 0x280   :  { %428 = vrcp.f32 %v353_v0 }
 0x281   :  { %430 = vrcp.f32 %v360_v1 }
 0x286   :  { %v429_v2 = vpop.eup %428 }
 0x287   :  { %v431_v3 = vpop.eup %430  ;;  %v363_v4 = vmul.f32 0.99601597, %v429_v2 }
 0x288   :  { %v364_v5 = vmul.f32 0.99601597, %v431_v3 }
 0x289   :  { %v365_v8 = vmul.f32 %v425_v50, %v363_v4 }
 0x28a   :  { %v366_v9 = vmul.f32 %v427_v51, %v364_v5 }
 0x28b   :  { %v367_v10 = vadd.f32 0.000996016, %v365_v8 }
 0x28c   :  { %v368_v6 = vadd.f32 0.000996016, %v366_v9 }
 0x28e   :  { %v371_v11 = vrot.slane %v368_v6, 4 }
 0x290   :  { %v372_v12 = vsel %vm326_vm2, %v367_v10, %v371_v11 }
 0x291   :  { %374 = vst [vmem:[#allocation7] sm:$0xff] %v372_v12 }
 0x292   :  { %385 = dma.vmem_to_hbm [thread:$0]  %s381_s1, 128, %s383_s23, [#allocation4]  }
 0x293   :  { %508 = dma.done.wait [#allocation4], 128  }
 0x294   :  { %509 = vsyncadd [#allocation4], 4294967168 }
 0x295   :  { %390 = vsyncpa [#allocation3], 1 }
 0x296   :  { %391 = vsyncpa [#allocation6], 1 }
 0x297   :  { %392 = vsyncpa [#allocation4], 1 }

</bundles_post_ra>
